<compile_context>
chip_gen: v6e
topology: v6e:2x2x1
jax: 0.10.0
libtpu: 0.0.40
codegen_flags: <defaults>
</compile_context>

<pallas_src>
import functools

import jax
import jax.numpy as jnp
from jax import lax
from jax.experimental import pallas as pl
from jax.experimental.pallas import tpu as pltpu

LANES = 128
MAX_BLOCK_ROWS = 4096  # 4096 x 128 f32 = 2 MiB per input tile


def _cdiv(a, b):
    return (a + b - 1) // b


def _round_up(a, b):
    return _cdiv(a, b) * b


def _charbonnier_kernel(x_ref, y_ref, o_ref, acc_ref, *, eps, n_rows, last_row_len):
    # Grid: (splits, blocks_per_split); axis 1 is the reduction axis.
    block_rows = x_ref.shape[0]
    c = pl.program_id(0)
    i = pl.program_id(1)
    bps = pl.num_programs(1)

    @pl.when(i == 0)
    def _():
        acc_ref[...] = jnp.zeros_like(acc_ref)

    x = x_ref[...].astype(jnp.float32)
    y = y_ref[...].astype(jnp.float32)
    d = x - y
    val = jnp.sqrt(d * d + eps)  # eps is a static Python float

    # Validity mask: handles (a) the partial last block, (b) the duplicated
    # trailing block of an uneven 2-way split, and (c) the sub-128 ragged tail
    # of the last row.  Cheap VPU work; the kernel is HBM-bound.
    row_start = (c * bps + i) * block_rows
    rows = lax.broadcasted_iota(jnp.int32, (block_rows, LANES), 0) + row_start
    if last_row_len == LANES:
        mask = rows < n_rows
    else:
        lanes = lax.broadcasted_iota(jnp.int32, (block_rows, LANES), 1)
        mask = (rows < (n_rows - 1)) | ((rows == (n_rows - 1)) & (lanes < last_row_len))
    val = jnp.where(mask, val, 0.0)

    # VPU-only partial accumulation into a vreg-shaped accumulator; the final
    # cross-lane/sublane reduction happens once, in the wrapper.
    acc_ref[...] += val.reshape(-1, 8, LANES).sum(axis=0)

    @pl.when(i == bps - 1)
    def _():
        o_ref[...] = acc_ref[...]


def charbonnier_loss(x, y, eps=1e-6):
    """Charbonnier loss: sum(sqrt((x - y)^2 + eps)). Returns a scalar (f32)."""
    assert x.shape == y.shape
    eps = float(eps)
    total = x.size
    if total == 0:
        return jnp.float32(0.0)

    # --- geometry (all static Python ints) ----------------------------------
    n_rows = _cdiv(total, LANES)                   # rows that contain valid data
    last_row_len = total - (n_rows - 1) * LANES    # valid lanes in the last row
    array_rows = max(n_rows, 8)                    # at least one (8,128) tile of rows
    n_pad = array_rows * LANES - total             # < 128, except for tiny inputs

    xr = jnp.ravel(x)
    yr = jnp.ravel(y)
    if n_pad:
        # TODO(synk): for very large inputs whose element count is not a multiple
        # of 128, jnp.pad materializes a full copy; a manual-DMA tail path would
        # avoid it.  Padded zeros are excluded by the in-kernel mask, so no
        # numerical correction is needed.
        xr = jnp.pad(xr, (0, n_pad))
        yr = jnp.pad(yr, (0, n_pad))
    xf = xr.reshape(array_rows, LANES)
    yf = yr.reshape(array_rows, LANES)

    if n_rows <= 8:
        block_rows = 8
    else:
        # Aim for >= 2 blocks so the leading "parallel" axis gives both v7x
        # TensorCores work, capped at MAX_BLOCK_ROWS for VMEM.
        block_rows = min(MAX_BLOCK_ROWS, _round_up(_cdiv(n_rows, 2), 8))
    n_blocks = _cdiv(n_rows, block_rows)
    splits = 2 if n_blocks >= 2 else 1   # 2 TCs on v7x; ~free on 1-TC v5e/v6e
    bps = _cdiv(n_blocks, splits)

    def in_map(c, i):
        # Clamp so the duplicated trailing step of an uneven split stays
        # in-bounds; its contribution is zeroed by the in-kernel mask.
        return (jnp.minimum(c * bps + i, n_blocks - 1), 0)

    kernel = functools.partial(
        _charbonnier_kernel, eps=eps, n_rows=n_rows, last_row_len=last_row_len)

    tile_bytes = block_rows * LANES * xf.dtype.itemsize
    # ~2x the double-buffered footprint of both inputs, clamped to a safe range.
    vmem_limit = int(min(64 << 20, max(16 << 20, 2 * (2 * 2 * tile_bytes) + (2 << 20))))

    partials = pl.pallas_call(
        kernel,
        out_shape=jax.ShapeDtypeStruct((splits * 8, LANES), jnp.float32),
        grid_spec=pltpu.PrefetchScalarGridSpec(
            num_scalar_prefetch=0,
            grid=(splits, bps),
            in_specs=[
                pl.BlockSpec((block_rows, LANES), in_map),
                pl.BlockSpec((block_rows, LANES), in_map),
            ],
            out_specs=pl.BlockSpec((8, LANES), lambda c, i: (c, 0)),
            scratch_shapes=[pltpu.VMEM((8, LANES), jnp.float32)],
        ),
        compiler_params=pltpu.CompilerParams(
            dimension_semantics=("parallel", "arbitrary"),
            vmem_limit_bytes=vmem_limit,
        ),
    )(xf, yf)

    return jnp.sum(partials)


if __name__ == "__main__":
    key = jax.random.PRNGKey(0)
    kx, ky = jax.random.split(key)

    # NCHW, matching the PyTorch module's typical usage (128-aligned size).
    x = jax.random.normal(kx, (2, 4, 16, 16), dtype=jnp.float32)
    y = jax.random.normal(ky, (2, 4, 16, 16), dtype=jnp.float32)
    loss = charbonnier_loss(x, y, eps=1e-6)
    jax.block_until_ready(loss)
    ref = jnp.sum(jnp.sqrt((x - y) ** 2 + 1e-6))
    assert jnp.allclose(loss, ref, rtol=1e-5, atol=1e-4), (loss, ref)

    # Ragged (non-128-multiple) shape: exercises the in-kernel mask path.
    kx2, ky2 = jax.random.split(ky)
    x2 = jax.random.normal(kx2, (3, 5, 7), dtype=jnp.float32)
    y2 = jax.random.normal(ky2, (3, 5, 7), dtype=jnp.float32)
    loss2 = charbonnier_loss(x2, y2, eps=1e-6)
    jax.block_until_ready(loss2)
    ref2 = jnp.sum(jnp.sqrt((x2 - y2) ** 2 + 1e-6))
    assert jnp.allclose(loss2, ref2, rtol=1e-5, atol=1e-4), (loss2, ref2)

    print("KERNEL_OK")
</pallas_src>

<mosaic_0001>
module attributes {stable_mosaic.version = 11 : i64} {
  func.func @_charbonnier_kernel(%arg0: i32, %arg1: i32, %arg2: memref<8x128xf32, #tpu.memory_space<vmem>>, %arg3: memref<8x128xf32, #tpu.memory_space<vmem>>, %arg4: memref<8x128xf32, #tpu.memory_space<vmem>>, %arg5: memref<8x128xf32, #tpu.memory_space<vmem>>) attributes {dimension_semantics = [#tpu.dimension_semantics<parallel>, #tpu.dimension_semantics<arbitrary>], iteration_bounds = array<i64: 2, 1>, scalar_prefetch = 0 : i64, scratch_operands = 1 : i64, tpu.core_type = #tpu.core_type<tc>, window_params = [{transform_indices = @transform_0, window_bounds = array<i64: 8, 128>}, {transform_indices = @transform_1, window_bounds = array<i64: 8, 128>}, {transform_indices = @transform_2, window_bounds = array<i64: 8, 128>}]} {
    %c0_i32 = arith.constant 0 : i32
    %0 = arith.cmpi eq, %arg1, %c0_i32 : i32
    %1 = arith.extui %0 : i1 to i32
    %c0_i32_0 = arith.constant 0 : i32
    %2 = arith.cmpi ne, %1, %c0_i32_0 : i32
    scf.if %2 {
      %cst_12 = arith.constant 0.000000e+00 : f32
      %28 = vector.broadcast %cst_12 : f32 to vector<8x128xf32>
      %c0_13 = arith.constant 0 : index
      %c0_14 = arith.constant 0 : index
      %29 = vector.load %arg5[%c0_13, %c0_14] : memref<8x128xf32, #tpu.memory_space<vmem>>, vector<8x128xf32>
      tpu.vector_store %arg5[%c0_13, %c0_14], %28 {strides = array<i32>} : memref<8x128xf32, #tpu.memory_space<vmem>>, vector<8x128xf32>,
    } else {
    }
    %c0 = arith.constant 0 : index
    %c0_1 = arith.constant 0 : index
    %3 = vector.load %arg2[%c0, %c0_1] : memref<8x128xf32, #tpu.memory_space<vmem>>, vector<8x128xf32>
    %c0_2 = arith.constant 0 : index
    %c0_3 = arith.constant 0 : index
    %4 = vector.load %arg3[%c0_2, %c0_3] : memref<8x128xf32, #tpu.memory_space<vmem>>, vector<8x128xf32>
    %5 = arith.subf %3, %4 : vector<8x128xf32>
    %6 = arith.mulf %5, %5 : vector<8x128xf32>
    %cst = arith.constant 9.99999997E-7 : f32
    %7 = vector.broadcast %cst : f32 to vector<8x128xf32>
    %8 = arith.addf %6, %7 : vector<8x128xf32>
    %9 = math.sqrt %8 : vector<8x128xf32>
    %c1_i32 = arith.constant 1 : i32
    %10 = arith.muli %arg0, %c1_i32 : i32
    %11 = arith.addi %10, %arg1 : i32
    %c8_i32 = arith.constant 8 : i32
    %12 = arith.muli %11, %c8_i32 : i32
    %13 = tpu.iota {dimensions = array<i32: 0>} : vector<8x128xi32>
    %14 = vector.broadcast %12 : i32 to vector<8x128xi32>
    %15 = arith.addi %13, %14 : vector<8x128xi32>
    %c16_i32 = arith.constant 16 : i32
    %16 = vector.broadcast %c16_i32 : i32 to vector<8x128xi32>
    %17 = arith.cmpi slt, %15, %16 : vector<8x128xi32>
    %cst_4 = arith.constant 0.000000e+00 : f32
    %18 = vector.broadcast %cst_4 : f32 to vector<8x128xf32>
    %19 = arith.select %17, %9, %18 : vector<8x128xi1>, vector<8x128xf32>
    %c0_5 = arith.constant 0 : index
    %c0_6 = arith.constant 0 : index
    %20 = vector.load %arg5[%c0_5, %c0_6] : memref<8x128xf32, #tpu.memory_space<vmem>>, vector<8x128xf32>
    %21 = vector.shape_cast %19 : vector<8x128xf32> to vector<1x8x128xf32>
    %cst_7 = arith.constant dense<0.000000e+00> : vector<8x128xf32>
    %22 = vector.multi_reduction <add>, %21, %cst_7 [0] : vector<1x8x128xf32> to vector<8x128xf32>
    %23 = arith.addf %20, %22 : vector<8x128xf32>
    %c0_8 = arith.constant 0 : index
    %c0_9 = arith.constant 0 : index
    %24 = vector.load %arg5[%c0_8, %c0_9] : memref<8x128xf32, #tpu.memory_space<vmem>>, vector<8x128xf32>
    tpu.vector_store %arg5[%c0_8, %c0_9], %23 {strides = array<i32>} : memref<8x128xf32, #tpu.memory_space<vmem>>, vector<8x128xf32>,
    %c0_i32_10 = arith.constant 0 : i32
    %25 = arith.cmpi eq, %arg1, %c0_i32_10 : i32
    %26 = arith.extui %25 : i1 to i32
    %c0_i32_11 = arith.constant 0 : i32
    %27 = arith.cmpi ne, %26, %c0_i32_11 : i32
    scf.if %27 {
      %c0_12 = arith.constant 0 : index
      %c0_13 = arith.constant 0 : index
      %28 = vector.load %arg5[%c0_12, %c0_13] : memref<8x128xf32, #tpu.memory_space<vmem>>, vector<8x128xf32>
      %c0_14 = arith.constant 0 : index
      %c0_15 = arith.constant 0 : index
      %29 = vector.load %arg4[%c0_14, %c0_15] : memref<8x128xf32, #tpu.memory_space<vmem>>, vector<8x128xf32>
      tpu.vector_store %arg4[%c0_14, %c0_15], %28 {strides = array<i32>} : memref<8x128xf32, #tpu.memory_space<vmem>>, vector<8x128xf32>,
    } else {
    }
    return
  }
  func.func @transform_0(%arg0: i32, %arg1: i32) -> (i32, i32) {
    %c1_i32 = arith.constant 1 : i32
    %0 = arith.muli %arg0, %c1_i32 : i32
    %1 = arith.addi %0, %arg1 : i32
    %c1_i32_0 = arith.constant 1 : i32
    %2 = arith.minsi %1, %c1_i32_0 : i32
    %c0_i32 = arith.constant 0 : i32
    %c0_i32_1 = arith.constant 0 : i32
    return %2, %c0_i32 : i32, i32
  }
  func.func @transform_1(%arg0: i32, %arg1: i32) -> (i32, i32) {
    %c1_i32 = arith.constant 1 : i32
    %0 = arith.muli %arg0, %c1_i32 : i32
    %1 = arith.addi %0, %arg1 : i32
    %c1_i32_0 = arith.constant 1 : i32
    %2 = arith.minsi %1, %c1_i32_0 : i32
    %c0_i32 = arith.constant 0 : i32
    %c0_i32_1 = arith.constant 0 : i32
    return %2, %c0_i32 : i32, i32
  }
  func.func @transform_2(%arg0: i32, %arg1: i32) -> (i32, i32) {
    %c0_i32 = arith.constant 0 : i32
    %c0_i32_0 = arith.constant 0 : i32
    return %arg0, %c0_i32 : i32, i32
  }
}

</mosaic_0001>

<bundles_post_ra>
// kernel: tpu_custom_call.1
= control target key start
LH: loop header
LB: loop body
LE: loop exit
PB: predicated region body
PF: predicated region fallthrough
CT: control target
= control target key end

     0   :  { %s874_s0 = inlined_call_operand.hbm [shape: f32[16,128], index: 0, kind: input, shape index: {}]   ;;  %s875_s1 = inlined_call_operand.hbm [shape: f32[16,128], index: 1, kind: input, shape index: {}]   ;;  %s876_s2 = inlined_call_operand.hbm [shape: f32[16,128], index: 2, kind: output, shape index: {}]  }
   0x1   :  { %877 = sst [smem:[#allocation12_spill]] %s874_s0 }
   0x2   :  { %7 = vsyncpa [#allocation4], 0 }
   0x3   :  { %9 = vsyncpa [#allocation4 + $0x1], 0 }
   0x4   :  { %10 = vsyncpa [#allocation7], 0 }
   0x5   :  { %12 = vsyncpa [#allocation7 + $0x1], 0 }
   0x6   :  { %13 = vsyncpa [#allocation5], 0 }
   0x7   :  { %15 = vsyncpa [#allocation5 + $0x1], 0  ;;  %s675_s9 = smov 0   ;;  %s677_s10 = smov 0  }
   0x8   :  { %s679_s11 = smov 0   ;;  %s681_s12 = smov 0  }
   0x9   :  { %s683_s13 = smov 0   ;;  %s685_s14 = smov 0  }
   0xa   :  { %s687_s15 = smov 0   ;;  %s689_s16 = smov 0  }
   0xb   :  { %s691_s17 = smov 0  }
   0xc LB: > { %s381_s18 = sadd.s32 4294967295, %s655_s17   ;;  %s382_s19 = sadd.s32 4294967294, %s655_s17   ;;  %s655_s17 = sphi %s691_s17, %s21_s17   ;;  %s651_s16 = sphi %s689_s16, %s893_s16   ;;  %s647_s15 = sphi %s687_s15, %s892_s15   ;;  %s643_s14 = sphi %s685_s14, %s891_s14   ;;  %s639_s13 = sphi %s683_s13, %s890_s13   ;;  %s635_s12 = sphi %s681_s12, %s889_s12   ;;  %s631_s11 = sphi %s679_s11, %s888_s11   ;;  %s627_s10 = sphi %s677_s10, %s887_s10   ;;  %s623_s9 = sphi %s675_s9, %s886_s9  }
   0xd   : > { %s33_s20 = sadd.s32 1, %s651_s16  ;;  %p38_p0 = scmp.lt.s32.totalorder %s651_s16, 1 }
   0xe   : > { %p35_p1 = scmp.ge.s32.totalorder %s33_s20, 2  ;;  %s46_s21 = sadd.s32 1, %s643_s14 }
   0xf   : > { %s724_s22 = scalar_select %p38_p0, %s651_s16, 1 }
  0x10   : > { %s895_s20 = smov (%p35_p1, %s33_s20), 0  ;;  %p53_p2 = scmp.ne.s32.totalorder %s643_s14, %s639_s13 }
  0x11   : > { %p54_p3 = scmp.eq.s32.totalorder %s655_s17, 0  ;;  %p41_p4 = scmp.lt.s32.totalorder %s895_s20, 1 }
  0x12   : > { %p59_p5 = scmp.ne.s32.totalorder %s639_s13, %s635_s12  ;;  %p60_p7 = scmp.eq.s32.totalorder %s381_s18, 0 }
  0x13   : > { %p733_p6 = por %p54_p3, %p53_p2  ;;  %s101_s26 = ssub.s32 %s651_s16, %s895_s20 }
  0x14   : > { %s42_s24 = scalar_select %p41_p4, %s895_s20, 1 }
  0x15   : > { %p738_p8 = por %p60_p7, %p59_p5  ;;  %p102_p9 = scmp.eq.s32.totalorder %s101_s26, 0 }
  0x16   : > { %s43_s27 = ssub.s32 %s724_s22, %s42_s24  ;;  %s104_s28 = sadd.s32 1, %s631_s11 }
  0x17   : > { %p44_p10 = scmp.eq.s32.totalorder %s43_s27, 0  ;;  %p114_p11 = scmp.ne.s32.totalorder %s631_s11, %s627_s10 }
  0x18   : > { %s747_s29 = scalar_select %p102_p9, %s631_s11, %s104_s28  }
  0x19   : > { %s750_s30 = scalar_select %p44_p10, %s643_s14, %s46_s21  }
  0x1a   : > { %p115_p12 = scmp.eq.s32.totalorder %s381_s18, 1  ;;  %p120_p13 = scmp.ne.s32.totalorder %s627_s10, %s623_s9 }
  0x1b   : > { %p121_p0 = scmp.eq.s32.totalorder %s382_s19, 1  ;;  %p415_p4 = scmp.lt.s32.totalorder %s655_s17, 2 }
  0x1c   : > { %p756_p1 = por %p115_p12, %p114_p11  ;;  %s767_s5 = sand.u32 1, %s643_s14  }
  0x1d   : > { %p761_p3 = por %p121_p0, %p120_p13  ;;  %s386_s6 = sshll.u32 %s724_s22, 7 }
  0x1e   : > { %s385_s7 = sshll.u32 %s767_s5, 3  ;;  %s882_s0 = sld [smem:[#allocation12_spill]] }
  0x1f   : > { %s145_s19 = scalar_lea.vmem [#allocation3], %s385_s7  ;;  %p776_p5 = pnand %p415_p4, %p733_p6 }
  0x20   : > { %s155_s21 = sshll.u32 %s145_s19, 4  ;;  %p389_p7 = scmp.ge.s32.totalorder %s655_s17, 1  ;;  %s156_s21 = int_to_ptr.vmem [resolvable:$true] %s155_s21 }
  0x21   : > { %p181_p9 = scmp.lt.s32.totalorder %s655_s17, 3  ;;  %s142_s26 = scalar_lea.sflag [#allocation4], %s767_s5 }
  0x22   : > { %p493_p10 = pneg %p776_p5  ;;  %s504_s22 = scalar_lea.vmem %s156_s21, 128 }
  0x23   : > { %p505_p11 = scmp.ne.s32.totalorder %s156_s21, %s504_s22  ;;  %s657_s27 = smov [#allocation3]  }
  0x24   : > { %s153_s18 = scalar_lea.hbm %s882_s0, %s386_s6  ;;  %s509_s23 = sshll.u32 %s657_s27, 4  ;;  %s510_s23 = int_to_ptr.vmem [resolvable:$false] %s509_s23 }
  0x25   : > { %p507_p12 = pnand %p505_p11, %p493_p10  ;;  %s511_s28 = scalar_lea.vmem %s510_s23, 256 }
  0x26   : > { %p512_p6 = scmp.lt.s32.totalorder %s156_s21, %s510_s23  ;;  %p513_p0 = scmp.lt.s32.totalorder %s511_s28, %s504_s22 }
  0x27   : > { %p508_p13 = pneg %p507_p12 }
  0x28   : > { %p514_p4 = por %p513_p0, %p512_p6 }
  0x2a   : > { %p515_p2 = pnand %p514_p4, %p508_p13 }
  0x2c   : > { %518 = shalt.err (!%p515_p2)
}
  0x2d   : > { %407 = dma.hbm_to_vmem [thread:$0]  (!%p776_p5), %s153_s18, 128, %s156_s21, %s142_s26  }
  0x2e   : > { %p794_p11 = pnand %p389_p7, %p181_p9  ;;  %s174_s22 = scalar_lea.hbm %s875_s1, %s386_s6 }
  0x2f   : > { %s166_s27 = scalar_lea.vmem [#allocation6], %s385_s7  ;;  %s163_s28 = scalar_lea.sflag [#allocation7], %s767_s5 }
  0x30   : > { %s176_s23 = sshll.u32 %s166_s27, 4  ;;  %s658_s18 = smov [#allocation6]   ;;  %s177_s23 = int_to_ptr.vmem [resolvable:$true] %s176_s23 }
  0x31   : > { %s532_s0 = scalar_lea.vmem %s177_s23, 128  ;;  %s537_s21 = sshll.u32 %s658_s18, 4  ;;  %s538_s21 = int_to_ptr.vmem [resolvable:$false] %s537_s21 }
  0x32   : > { %p533_p2 = scmp.ne.s32.totalorder %s177_s23, %s532_s0  ;;  %s539_s26 = scalar_lea.vmem %s538_s21, 256 }
  0x33   : > { %p540_p7 = scmp.lt.s32.totalorder %s177_s23, %s538_s21  ;;  %p541_p9 = scmp.lt.s32.totalorder %s539_s26, %s532_s0 }
  0x34   : > { %p535_p12 = pnand %p533_p2, %p493_p10 }
  0x35   : > { %p542_p6 = por %p541_p9, %p540_p7 }
  0x36   : > { %p536_p13 = pneg %p535_p12 }
  0x38   : > { %p543_p0 = pnand %p542_p6, %p536_p13 }
  0x3a   : > { %546 = shalt.err (!%p543_p0)
}
  0x3b   : > { %410 = dma.hbm_to_vmem [thread:$0]  (!%p776_p5), %s174_s22, 128, %s177_s23, %s163_s28  }
  0x3c   : > { %185 = sbr.rel (%p794_p11) target bundleno = 107 (0x6b), region = 28  ;;  %s187_s5 = sand.u32 (!%p794_p11), 1, %s639_s13  }
  0x3d   : > { %s390_s6 = sshll.u32 (!%p794_p11), %s187_s5, 3  ;;  %s188_s7 = scalar_lea.sflag (!%p794_p11), [#allocation4], %s187_s5 }
  0x3e   : > { %s191_s12 = scalar_lea.vmem (!%p794_p11), [#allocation3], %s390_s6 }
  0x41   : > { %610 = dma.done.wait (%p738_p8), %s188_s7, 128  }
  0x42   : > { %612 = vsyncadd (%p738_p8), %s188_s7, 4294967168  ;;  %s197_s0 = scalar_lea.sflag [#allocation7], %s187_s5  ;;  %s200_s19 = scalar_lea.vmem [#allocation6], %s390_s6 }
  0x43   : > { %614 = dma.done.wait (%p738_p8), %s197_s0, 128  }
  0x44   : > { %616 = vsyncadd (%p738_p8), %s197_s0, 4294967168  ;;  %v237_v0 = vld [vmem:[%s191_s12] sm:$0xff]  ;;  %v238_v1 = vld [vmem:[%s200_s19] sm:$0xff]  ;;  %v251_v5 = vlaneseq  ;;  %s223_s24 = sand.u32 1, %s627_s10   ;;  %s393_s8 = sshll.u32 %s647_s15, 3 }
  0x45   : > { %v239_v2 = vsub.f32 %v237_v0, %v238_v1  ;;  %s392_s22 = sshll.u32 %s223_s24, 3  ;;  %v253_v7 = vstv %s393_s8  ;;  %s395_s23 = sshll.u32 %s647_s15, 7 }
  0x46   : > { %v252_v6 = vshrl.u32 %v251_v5, 7  ;;  %s225_s25 = scalar_lea.vmem [#allocation8], %s392_s22  ;;  %s278_s21 = scalar_lea.hbm %s876_s2, %s395_s23 }
  0x47   : > { %v240_v3 = vmul.f32 %v239_v2, %v239_v2  ;;  %s280_s27 = sshll.u32 %s225_s25, 4  ;;  %s267_s26 = scalar_lea.sflag [#allocation5], %s223_s24  ;;  %s821_s27 = int_to_ptr.vmem [resolvable:$true] %s280_s27 }
  0x48   : > { %v254_v8 = vadd.s32 %v253_v7, %v252_v6  ;;  %s547_s5 = scalar_lea.vmem %s821_s27, 128  ;;  %s659_s15 = smov [#allocation8]  }
  0x49   : > { %v241_v4 = vadd.f32 1e-06, %v240_v3  ;;  %p548_p8 = scmp.ne.s32.totalorder %s821_s27, %s547_s5  ;;  %s551_s6 = sshll.u32 %s659_s15, 4  ;;  %s552_s6 = int_to_ptr.vmem [resolvable:$false] %s551_s6 }
  0x4a   : > { %vm255_vm2 = vcmp.lt.s32.totalorder %v254_v8, 16  ;;  %s553_s7 = scalar_lea.vmem %s552_s6, 256  ;;  %p554_p4 = scmp.lt.s32.totalorder %s821_s27, %s552_s6 }
  0x4b   : > { %489 = vrsqrt.f32 %v241_v4  ;;  %vm244_vm0 = vcmp.eq.f32.partialorder %v241_v4, inf  ;;  %v247_v10 = vand.u32 2147483648, %v241_v4  ;;  %vm246_vm1 = vcmp.eq.f32.partialorder %v241_v4, 0.0  ;;  %p549_p5 = pnand %p548_p8, %p756_p1  ;;  %p555_p11 = scmp.lt.s32.totalorder %s553_s7, %s547_s5 }
  0x4d   : > { %p550_p10 = pneg %p549_p5  ;;  %p556_p2 = por %p555_p11, %p554_p4 }
  0x4f   : > { %p557_p12 = pnand %p556_p2, %p550_p10 }
  0x58   : > { %v490_v9 = vpop.eup %489 }
  0x59   : > { %v243_v11 = vmul.f32 %v490_v9, %v241_v4 }
  0x5b   : > { %v245_v12 = vsel %vm244_vm0, %v241_v4, %v243_v11 }
  0x5c   : > { %v248_v13 = vsel %vm246_vm1, %v247_v10, %v245_v12 }
  0x5d   : > { %v256_v14 = vsel %vm255_vm2, %v248_v13, 0.0 }
  0x5e   : > { %265 = vst [vmem:[%s225_s25] sm:$0xff] %v256_v14 }
  0x5f   : > { %560 = shalt.err (!%p557_p12)
}
  0x60   : > { %s561_s12 = scalar_lea.hbm %s278_s21, 128  ;;  %s565_s24 = scalar_lea.hbm %s876_s2, 256 }
  0x61   : > { %p562_p13 = scmp.ne.s32.totalorder %s278_s21, %s561_s12  ;;  %p566_p6 = scmp.lt.s32.totalorder %s278_s21, %s876_s2 }
  0x62   : > { %p567_p0 = scmp.lt.s32.totalorder %s565_s24, %s561_s12 }
  0x63   : > { %p563_p7 = pnand %p562_p13, %p756_p1 }
  0x64   : > { %p568_p8 = por %p567_p0, %p566_p6 }
  0x65   : > { %p564_p9 = pneg %p563_p7 }
  0x67   : > { %p569_p5 = pnand %p568_p8, %p564_p9 }
  0x69   : > { %572 = shalt.err (!%p569_p5)
}
  0x6a   : > { %402 = dma.vmem_to_hbm [thread:$0]  (%p756_p1), %s821_s27, 128, %s278_s21, %s267_s26  }
  0x6b PF: > { %s292_s25 = sand.u32 1, %s623_s9   ;;  %p885_p10 = scmp.ge.s32.totalorder %s655_s17, 2 }
  0x6c   : > { %s293_s23 = scalar_lea.sflag [#allocation5], %s292_s25 }
  0x6d   : > { %p412_p4 = pnand %p885_p10, %p761_p3 }
  0x6f   : > { %p413_p11 = pneg %p412_p4 }
  0x71   : > { %618 = dma.done.wait (%p413_p11), %s293_s23, 128  }
  0x72   : > { %620 = vsyncadd (%p413_p11), %s293_s23, 4294967168  ;;  %s21_s17 = sadd.s32 1, %s655_s17   ;;  %s886_s9 = smov %s627_s10 }
  0x73   : > { %p18_p2 = scmp.ge.s32.totalorder %s21_s17, 4   ;;  %s887_s10 = smov %s631_s11 }
  0x74   : > { %s888_s11 = smov %s747_s29  ;;  %s889_s12 = smov %s639_s13 }
  0x75   : > { %s890_s13 = smov %s643_s14  ;;  %s891_s14 = smov %s750_s30 }
  0x76   : > { %s892_s15 = smov %s651_s16  ;;  %s893_s16 = smov %s895_s20 }
  0x77   :  { %20 = sbr.rel (!%p18_p2) target bundleno = 12 (0xc), region = 94 }
  0x7c   :  { %298 = vsyncpa [#allocation4], 1 }
  0x7d   :  { %300 = vsyncpa [#allocation4 + $0x1], 1 }
  0x7e   :  { %301 = vsyncpa [#allocation7], 1 }
  0x7f   :  { %303 = vsyncpa [#allocation7 + $0x1], 1 }
  0x80   :  { %304 = vsyncpa [#allocation5], 1 }
  0x81   :  { %306 = vsyncpa [#allocation5 + $0x1], 1 }

</bundles_post_ra>
